<compile_context>
chip_gen: v5e
topology: v5e:2x2
jax: 0.10.0
libtpu: 0.0.40
codegen_flags: <defaults>
</compile_context>

<pallas_src>
import functools

import numpy as np

import jax
import jax.numpy as jnp
from jax.experimental import pallas as pl
from jax.experimental.pallas import tpu as pltpu


# ------------------------------ fused encoder kernel ------------------------------

def _encoder_fused_kernel(x_ref, slab_ref, eps_ref, out_ref, *, T, H, Z, n_in_pad):
    # x_ref:    (T*B, n_in_pad)  time-major rows = [x_t | x_{T-1-t} | 1 | 0-pad]
    # slab_ref: (n_in_pad + 4H + 8, 8H)  packed weights (see prepare_encoder_params)
    # eps_ref:  (B, Z)
    # out_ref:  (B, 3Z)  lanes = [z | mu | sigma_hat]
    B = eps_ref.shape[0]
    H2 = 2 * H

    r0 = n_in_pad
    r1 = r0 + H2
    r2 = r1 + H2
    w_in = slab_ref[0:r0, :]            # (n_in_pad, 8H) block-diag input proj + bias row
    w_hh = slab_ref[r0:r1, :]           # (2H, 8H)       block-diag hidden recurrence
    w_head = slab_ref[r1:r2, :]         # (2H, 8H)       [mu|sigma_hat] head (zero-padded cols)
    b_head = slab_ref[r2:r2 + 1, :]     # (1, 8H)

    # Input projection + biases for BOTH directions and ALL time steps: one MXU matmul.
    xp = jnp.dot(x_ref[...], w_in, preferred_element_type=jnp.float32)      # (T*B, 8H)

    # Merged bidirectional recurrence; state lanes [0:H]=forward, [H:2H]=backward.
    h = jnp.zeros((B, H2), jnp.float32)
    c = jnp.zeros((B, H2), jnp.float32)
    for s in range(T):                   # small static T -> fully unrolled, static slices
        gates = xp[s * B:(s + 1) * B, :] + jnp.dot(
            h, w_hh, preferred_element_type=jnp.float32)                    # (B, 8H)
        # Full-width activations: one EUP pass each (review: do not narrow these).
        sig_all = jax.nn.sigmoid(gates)
        tanh_all = jnp.tanh(gates)
        # Gate-major lane layout -> only 4 contiguous (B, 2H) slices per step.
        i_g = sig_all[:, 0 * H2:1 * H2]
        f_g = sig_all[:, 1 * H2:2 * H2]
        g_g = tanh_all[:, 2 * H2:3 * H2]
        o_g = sig_all[:, 3 * H2:4 * H2]
        c = f_g * c + i_g * g_g
        h = o_g * jnp.tanh(c)

    # h already IS [h_forward | h_backward] -> head matmul directly (no concat needed).
    head = jnp.dot(h, w_head, preferred_element_type=jnp.float32) + b_head   # (B, 8H)
    mu = head[:, 0:Z]
    sig_hat = head[:, Z:2 * Z]
    z = mu + jnp.exp(sig_hat * 0.5) * eps_ref[...]

    out_ref[...] = jnp.concatenate([z, mu, sig_hat], axis=1)    # single store / DMA


# ------------------------- one-time parameter layout prep -------------------------

def prepare_encoder_params(params):
    """One-time weight layout prep (call once; reuse the result across forward calls).

    Slab rows (each section 8-sublane aligned), all 8H columns wide:
      [0 : n_in_pad)          block-diag input projection (+ folded LSTM biases, 0-pad)
      [n_in_pad : +2H)        block-diag hidden recurrence
      [+2H : +4H)             stacked [mu | sigma_hat] head, zero-padded to 8H cols
      [+4H : +4H+8)           head bias row (+7 zero-pad rows)
    Gate-major lane layout: [i_f,i_b,f_f,f_b,g_f,g_b,o_f,o_b], each block H lanes wide.
    """
    w_ih, w_hh, b = params["w_ih"], params["w_hh"], params["b"]
    H4, I = w_ih.shape[1], w_ih.shape[2]
    H = H4 // 4
    Z = params["w_mu"].shape[0]
    assert (2 * H) % 8 == 0 and 2 * Z <= 8 * H

    def gate_major(cols_f, cols_b):
        # (R, 4H) forward-dir cols + (R, 4H) backward-dir cols -> (R, 8H) gate-major.
        R = cols_f.shape[0]
        cf = cols_f.reshape(R, 4, 1, H)
        cb = cols_b.reshape(R, 4, 1, H)
        return jnp.concatenate([cf, cb], axis=2).reshape(R, 8 * H)

    z_i = jnp.zeros((I, 4 * H), jnp.float32)
    z_h = jnp.zeros((H, 4 * H), jnp.float32)

    n_in = 2 * I + 1
    n_in_pad = ((n_in + 7) // 8) * 8
    w_in_blk = jnp.concatenate([
        gate_major(w_ih[0].T, z_i),                    # rows 0:I    <- x_t
        gate_major(z_i, w_ih[1].T),                    # rows I:2I   <- x_{T-1-t}
        gate_major(b[0:1], b[1:2]),                    # row 2I      <- ones column (bias fold)
        jnp.zeros((n_in_pad - n_in, 8 * H), jnp.float32),
    ], axis=0)                                         # (n_in_pad, 8H)

    w_hh_blk = jnp.concatenate([
        gate_major(w_hh[0].T, z_h),                    # rows 0:H   <- h_forward
        gate_major(z_h, w_hh[1].T),                    # rows H:2H  <- h_backward
    ], axis=0)                                         # (2H, 8H)

    w_head = jnp.concatenate([params["w_mu"], params["w_sig"]], axis=0).T   # (2H, 2Z)
    b_head = jnp.concatenate([params["b_mu"], params["b_sig"]], axis=1)     # (1, 2Z)
    w_head_p = jnp.pad(w_head, ((0, 0), (0, 8 * H - 2 * Z)))                # (2H, 8H)
    b_head_p = jnp.pad(b_head, ((0, 7), (0, 8 * H - 2 * Z)))                # (8, 8H)

    slab = jnp.concatenate([w_in_blk, w_hh_blk, w_head_p, b_head_p], axis=0)
    meta = dict(I=I, H=H, Z=Z, n_in_pad=n_in_pad)
    return slab, meta


# ---------------------------------- wrapper ----------------------------------

def encoder_forward(x, prepared, key):
    """x: (T, B, input_size) time-major. Returns (z, mu, sigma_hat), each (B, Z)."""
    slab, meta = prepared
    I, H, Z, n_in_pad = meta["I"], meta["H"], meta["Z"], meta["n_in_pad"]
    T, B, _ = x.shape

    # Merged time-major rows [x_t | x_{T-1-t} | 1 | 0-pad].  (Tiny per-call fusion on x;
    # all per-call WEIGHT prep flagged by the review lives in prepare_encoder_params.)
    x = x.astype(jnp.float32)
    ones = jnp.ones((T, B, 1), jnp.float32)
    zpad = jnp.zeros((T, B, n_in_pad - 2 * I - 1), jnp.float32)
    x_merged = jnp.concatenate([x, x[::-1], ones, zpad], axis=-1).reshape(T * B, n_in_pad)

    # torch.randn_like(mu): host RNG kept so the reference check stays bit-compatible.
    # TODO(synk): generate eps in-kernel (pltpu.prng_seed + pltpu.stateful_normal) to
    # drop this input DMA + the separate XLA RNG kernel (needs a statistical check).
    eps = jax.random.normal(key, (B, Z), jnp.float32)

    vmem = pl.BlockSpec(memory_space=pltpu.MemorySpace.VMEM)
    out = pl.pallas_call(
        functools.partial(_encoder_fused_kernel, T=T, H=H, Z=Z, n_in_pad=n_in_pad),
        out_shape=jax.ShapeDtypeStruct((B, 3 * Z), jnp.float32),
        in_specs=[vmem, vmem, vmem],
        out_specs=vmem,
    )(x_merged, slab, eps)
    return out[:, 0:Z], out[:, Z:2 * Z], out[:, 2 * Z:3 * Z]


# ----------------------------- params / reference -----------------------------

def init_params(key, input_size, h_size, z_size):
    ks = jax.random.split(key, 7)
    s = 0.1
    return dict(
        w_ih=jax.random.normal(ks[0], (2, 4 * h_size, input_size), jnp.float32) * s,
        w_hh=jax.random.normal(ks[1], (2, 4 * h_size, h_size), jnp.float32) * s,
        b=jax.random.normal(ks[2], (2, 4 * h_size), jnp.float32) * s,   # = b_ih + b_hh
        w_mu=jax.random.normal(ks[3], (z_size, 2 * h_size), jnp.float32) * s,
        b_mu=jax.random.normal(ks[4], (1, z_size), jnp.float32) * s,
        w_sig=jax.random.normal(ks[5], (z_size, 2 * h_size), jnp.float32) * s,
        b_sig=jax.random.normal(ks[6], (1, z_size), jnp.float32) * s,
    )


def _encoder_ref(x, params, eps):
    """Pure-JAX reference of the PyTorch forward (for correctness checking)."""
    T, B, _ = x.shape
    H = params["w_hh"].shape[2]

    def run(d, xs):
        h = jnp.zeros((B, H), jnp.float32)
        c = jnp.zeros((B, H), jnp.float32)
        for t in range(T):
            gates = (xs[t] @ params["w_ih"][d].T + h @ params["w_hh"][d].T
                     + params["b"][d])
            i = jax.nn.sigmoid(gates[:, :H])
            f = jax.nn.sigmoid(gates[:, H:2 * H])
            g = jnp.tanh(gates[:, 2 * H:3 * H])
            o = jax.nn.sigmoid(gates[:, 3 * H:])
            c = f * c + i * g
            h = o * jnp.tanh(c)
        return h

    h_f = run(0, x)
    h_b = run(1, x[::-1])
    h_cat = jnp.concatenate([h_f, h_b], axis=1)
    mu = h_cat @ params["w_mu"].T + params["b_mu"]
    sig_hat = h_cat @ params["w_sig"].T + params["b_sig"]
    z = mu + jnp.exp(sig_hat / 2.0) * eps
    return z, mu, sig_hat


# ------------------------------------ main ------------------------------------

if __name__ == "__main__":
    key = jax.random.PRNGKey(0)
    k_param, k_x, k_eps = jax.random.split(key, 3)

    T, B, INPUT_SIZE, H_SIZE, Z_SIZE = 8, 2, 5, 32, 16

    params = init_params(k_param, INPUT_SIZE, H_SIZE, Z_SIZE)
    prepared = prepare_encoder_params(params)          # one-time layout prep
    x = jax.random.normal(k_x, (T, B, INPUT_SIZE), jnp.float32)

    z, mu, sig_hat = encoder_forward(x, prepared, k_eps)
    jax.block_until_ready((z, mu, sig_hat))

    assert z.shape == (B, Z_SIZE) and mu.shape == (B, Z_SIZE) and sig_hat.shape == (B, Z_SIZE)

    # Correctness check against a pure-JAX reference (same eps).  Tolerance per review:
    # in-kernel matmuls run at default MXU precision vs "highest" in the reference.
    eps = jax.random.normal(k_eps, (B, Z_SIZE), jnp.float32)
    with jax.default_matmul_precision("highest"):
        z_ref, mu_ref, sig_ref = _encoder_ref(x, params, eps)
    np.testing.assert_allclose(np.asarray(mu), np.asarray(mu_ref), rtol=2e-3, atol=2e-3)
    np.testing.assert_allclose(np.asarray(sig_hat), np.asarray(sig_ref), rtol=2e-3, atol=2e-3)
    np.testing.assert_allclose(np.asarray(z), np.asarray(z_ref), rtol=2e-3, atol=2e-3)

    print("KERNEL_OK")
</pallas_src>

<mosaic_0001>
module attributes {stable_mosaic.version = 11 : i64} {
  func.func @_encoder_fused_kernel(%arg0: memref<16x16xf32, #tpu.memory_space<vmem>>, %arg1: memref<152x256xf32, #tpu.memory_space<vmem>>, %arg2: memref<2x16xf32, #tpu.memory_space<vmem>>, %arg3: memref<2x48xf32, #tpu.memory_space<vmem>>) attributes {dimension_semantics = [], scalar_prefetch = 0 : i64, scratch_operands = 0 : i64, tpu.core_type = #tpu.core_type<tc>} {
    %c0 = arith.constant 0 : index
    %c0_0 = arith.constant 0 : index
    %0 = vector.load %arg1[%c0, %c0_0] : memref<152x256xf32, #tpu.memory_space<vmem>>, vector<16x256xf32>
    %c16 = arith.constant 16 : index
    %c0_1 = arith.constant 0 : index
    %1 = vector.load %arg1[%c16, %c0_1] : memref<152x256xf32, #tpu.memory_space<vmem>>, vector<64x256xf32>
    %c80 = arith.constant 80 : index
    %c0_2 = arith.constant 0 : index
    %2 = vector.load %arg1[%c80, %c0_2] : memref<152x256xf32, #tpu.memory_space<vmem>>, vector<64x256xf32>
    %c144 = arith.constant 144 : index
    %c0_3 = arith.constant 0 : index
    %3 = vector.load %arg1[%c144, %c0_3] : memref<152x256xf32, #tpu.memory_space<vmem>>, vector<1x256xf32>
    %c0_4 = arith.constant 0 : index
    %c0_5 = arith.constant 0 : index
    %4 = vector.load %arg0[%c0_4, %c0_5] : memref<16x16xf32, #tpu.memory_space<vmem>>, vector<16x16xf32>
    %cst = arith.constant dense<0.000000e+00> : vector<16x256xf32>
    %5 = tpu.matmul %4, %0, %cst {dimension_numbers = #tpu.dot_dimension_numbers<[1], [0], [0], [1], [0, 0, 1, 1], [], []>} : vector<16x16xf32>, vector<16x256xf32>, vector<16x256xf32> -> vector<16x256xf32>
    %cst_6 = arith.constant 0.000000e+00 : f32
    %6 = vector.broadcast %cst_6 : f32 to vector<2x64xf32>
    %cst_7 = arith.constant 0.000000e+00 : f32
    %7 = vector.broadcast %cst_7 : f32 to vector<2x64xf32>
    %8 = vector.extract_strided_slice %5 {offsets = [0, 0], sizes = [2, 256], strides = [1, 1]} : vector<16x256xf32> to vector<2x256xf32>
    %cst_8 = arith.constant dense<0.000000e+00> : vector<2x256xf32>
    %9 = tpu.matmul %6, %1, %cst_8 {dimension_numbers = #tpu.dot_dimension_numbers<[1], [0], [0], [1], [0, 0, 1, 1], [], []>} : vector<2x64xf32>, vector<64x256xf32>, vector<2x256xf32> -> vector<2x256xf32>
    %10 = arith.addf %8, %9 : vector<2x256xf32>
    %11 = arith.negf %10 : vector<2x256xf32>
    %12 = math.exp %11 : vector<2x256xf32>
    %cst_9 = arith.constant 1.000000e+00 : f32
    %13 = vector.broadcast %cst_9 : f32 to vector<2x256xf32>
    %14 = arith.addf %13, %12 : vector<2x256xf32>
    %15 = arith.divf %13, %14 : vector<2x256xf32>
    %16 = math.tanh %10 : vector<2x256xf32>
    %17 = vector.extract_strided_slice %15 {offsets = [0, 0], sizes = [2, 64], strides = [1, 1]} : vector<2x256xf32> to vector<2x64xf32>
    %18 = vector.extract_strided_slice %15 {offsets = [0, 64], sizes = [2, 64], strides = [1, 1]} : vector<2x256xf32> to vector<2x64xf32>
    %19 = vector.extract_strided_slice %16 {offsets = [0, 128], sizes = [2, 64], strides = [1, 1]} : vector<2x256xf32> to vector<2x64xf32>
    %20 = vector.extract_strided_slice %15 {offsets = [0, 192], sizes = [2, 64], strides = [1, 1]} : vector<2x256xf32> to vector<2x64xf32>
    %21 = arith.mulf %18, %7 : vector<2x64xf32>
    %22 = arith.mulf %17, %19 : vector<2x64xf32>
    %23 = arith.addf %21, %22 : vector<2x64xf32>
    %24 = math.tanh %23 : vector<2x64xf32>
    %25 = arith.mulf %20, %24 : vector<2x64xf32>
    %26 = vector.extract_strided_slice %5 {offsets = [2, 0], sizes = [2, 256], strides = [1, 1]} : vector<16x256xf32> to vector<2x256xf32>
    %cst_10 = arith.constant dense<0.000000e+00> : vector<2x256xf32>
    %27 = tpu.matmul %25, %1, %cst_10 {dimension_numbers = #tpu.dot_dimension_numbers<[1], [0], [0], [1], [0, 0, 1, 1], [], []>} : vector<2x64xf32>, vector<64x256xf32>, vector<2x256xf32> -> vector<2x256xf32>
    %28 = arith.addf %26, %27 : vector<2x256xf32>
    %29 = arith.negf %28 : vector<2x256xf32>
    %30 = math.exp %29 : vector<2x256xf32>
    %cst_11 = arith.constant 1.000000e+00 : f32
    %31 = vector.broadcast %cst_11 : f32 to vector<2x256xf32>
    %32 = arith.addf %31, %30 : vector<2x256xf32>
    %33 = arith.divf %31, %32 : vector<2x256xf32>
    %34 = math.tanh %28 : vector<2x256xf32>
    %35 = vector.extract_strided_slice %33 {offsets = [0, 0], sizes = [2, 64], strides = [1, 1]} : vector<2x256xf32> to vector<2x64xf32>
    %36 = vector.extract_strided_slice %33 {offsets = [0, 64], sizes = [2, 64], strides = [1, 1]} : vector<2x256xf32> to vector<2x64xf32>
    %37 = vector.extract_strided_slice %34 {offsets = [0, 128], sizes = [2, 64], strides = [1, 1]} : vector<2x256xf32> to vector<2x64xf32>
    %38 = vector.extract_strided_slice %33 {offsets = [0, 192], sizes = [2, 64], strides = [1, 1]} : vector<2x256xf32> to vector<2x64xf32>
    %39 = arith.mulf %36, %23 : vector<2x64xf32>
    %40 = arith.mulf %35, %37 : vector<2x64xf32>
    %41 = arith.addf %39, %40 : vector<2x64xf32>
    %42 = math.tanh %41 : vector<2x64xf32>
    %43 = arith.mulf %38, %42 : vector<2x64xf32>
    %44 = vector.extract_strided_slice %5 {offsets = [4, 0], sizes = [2, 256], strides = [1, 1]} : vector<16x256xf32> to vector<2x256xf32>
    %cst_12 = arith.constant dense<0.000000e+00> : vector<2x256xf32>
    %45 = tpu.matmul %43, %1, %cst_12 {dimension_numbers = #tpu.dot_dimension_numbers<[1], [0], [0], [1], [0, 0, 1, 1], [], []>} : vector<2x64xf32>, vector<64x256xf32>, vector<2x256xf32> -> vector<2x256xf32>
    %46 = arith.addf %44, %45 : vector<2x256xf32>
    %47 = arith.negf %46 : vector<2x256xf32>
    %48 = math.exp %47 : vector<2x256xf32>
    %cst_13 = arith.constant 1.000000e+00 : f32
    %49 = vector.broadcast %cst_13 : f32 to vector<2x256xf32>
    %50 = arith.addf %49, %48 : vector<2x256xf32>
    %51 = arith.divf %49, %50 : vector<2x256xf32>
    %52 = math.tanh %46 : vector<2x256xf32>
    %53 = vector.extract_strided_slice %51 {offsets = [0, 0], sizes = [2, 64], strides = [1, 1]} : vector<2x256xf32> to vector<2x64xf32>
    %54 = vector.extract_strided_slice %51 {offsets = [0, 64], sizes = [2, 64], strides = [1, 1]} : vector<2x256xf32> to vector<2x64xf32>
    %55 = vector.extract_strided_slice %52 {offsets = [0, 128], sizes = [2, 64], strides = [1, 1]} : vector<2x256xf32> to vector<2x64xf32>
    %56 = vector.extract_strided_slice %51 {offsets = [0, 192], sizes = [2, 64], strides = [1, 1]} : vector<2x256xf32> to vector<2x64xf32>
    %57 = arith.mulf %54, %41 : vector<2x64xf32>
    %58 = arith.mulf %53, %55 : vector<2x64xf32>
    %59 = arith.addf %57, %58 : vector<2x64xf32>
    %60 = math.tanh %59 : vector<2x64xf32>
    %61 = arith.mulf %56, %60 : vector<2x64xf32>
    %62 = vector.extract_strided_slice %5 {offsets = [6, 0], sizes = [2, 256], strides = [1, 1]} : vector<16x256xf32> to vector<2x256xf32>
    %cst_14 = arith.constant dense<0.000000e+00> : vector<2x256xf32>
    %63 = tpu.matmul %61, %1, %cst_14 {dimension_numbers = #tpu.dot_dimension_numbers<[1], [0], [0], [1], [0, 0, 1, 1], [], []>} : vector<2x64xf32>, vector<64x256xf32>, vector<2x256xf32> -> vector<2x256xf32>
    %64 = arith.addf %62, %63 : vector<2x256xf32>
    %65 = arith.negf %64 : vector<2x256xf32>
    %66 = math.exp %65 : vector<2x256xf32>
    %cst_15 = arith.constant 1.000000e+00 : f32
    %67 = vector.broadcast %cst_15 : f32 to vector<2x256xf32>
    %68 = arith.addf %67, %66 : vector<2x256xf32>
    %69 = arith.divf %67, %68 : vector<2x256xf32>
    %70 = math.tanh %64 : vector<2x256xf32>
    %71 = vector.extract_strided_slice %69 {offsets = [0, 0], sizes = [2, 64], strides = [1, 1]} : vector<2x256xf32> to vector<2x64xf32>
    %72 = vector.extract_strided_slice %69 {offsets = [0, 64], sizes = [2, 64], strides = [1, 1]} : vector<2x256xf32> to vector<2x64xf32>
    %73 = vector.extract_strided_slice %70 {offsets = [0, 128], sizes = [2, 64], strides = [1, 1]} : vector<2x256xf32> to vector<2x64xf32>
    %74 = vector.extract_strided_slice %69 {offsets = [0, 192], sizes = [2, 64], strides = [1, 1]} : vector<2x256xf32> to vector<2x64xf32>
    %75 = arith.mulf %72, %59 : vector<2x64xf32>
    %76 = arith.mulf %71, %73 : vector<2x64xf32>
    %77 = arith.addf %75, %76 : vector<2x64xf32>
    %78 = math.tanh %77 : vector<2x64xf32>
    %79 = arith.mulf %74, %78 : vector<2x64xf32>
    %80 = vector.extract_strided_slice %5 {offsets = [8, 0], sizes = [2, 256], strides = [1, 1]} : vector<16x256xf32> to vector<2x256xf32>
    %cst_16 = arith.constant dense<0.000000e+00> : vector<2x256xf32>
    %81 = tpu.matmul %79, %1, %cst_16 {dimension_numbers = #tpu.dot_dimension_numbers<[1], [0], [0], [1], [0, 0, 1, 1], [], []>} : vector<2x64xf32>, vector<64x256xf32>, vector<2x256xf32> -> vector<2x256xf32>
    %82 = arith.addf %80, %81 : vector<2x256xf32>
    %83 = arith.negf %82 : vector<2x256xf32>
    %84 = math.exp %83 : vector<2x256xf32>
    %cst_17 = arith.constant 1.000000e+00 : f32
    %85 = vector.broadcast %cst_17 : f32 to vector<2x256xf32>
    %86 = arith.addf %85, %84 : vector<2x256xf32>
    %87 = arith.divf %85, %86 : vector<2x256xf32>
    %88 = math.tanh %82 : vector<2x256xf32>
    %89 = vector.extract_strided_slice %87 {offsets = [0, 0], sizes = [2, 64], strides = [1, 1]} : vector<2x256xf32> to vector<2x64xf32>
    %90 = vector.extract_strided_slice %87 {offsets = [0, 64], sizes = [2, 64], strides = [1, 1]} : vector<2x256xf32> to vector<2x64xf32>
    %91 = vector.extract_strided_slice %88 {offsets = [0, 128], sizes = [2, 64], strides = [1, 1]} : vector<2x256xf32> to vector<2x64xf32>
    %92 = vector.extract_strided_slice %87 {offsets = [0, 192], sizes = [2, 64], strides = [1, 1]} : vector<2x256xf32> to vector<2x64xf32>
    %93 = arith.mulf %90, %77 : vector<2x64xf32>
    %94 = arith.mulf %89, %91 : vector<2x64xf32>
    %95 = arith.addf %93, %94 : vector<2x64xf32>
    %96 = math.tanh %95 : vector<2x64xf32>
    %97 = arith.mulf %92, %96 : vector<2x64xf32>
    %98 = vector.extract_strided_slice %5 {offsets = [10, 0], sizes = [2, 256], strides = [1, 1]} : vector<16x256xf32> to vector<2x256xf32>
    %cst_18 = arith.constant dense<0.000000e+00> : vector<2x256xf32>
    %99 = tpu.matmul %97, %1, %cst_18 {dimension_numbers = #tpu.dot_dimension_numbers<[1], [0], [0], [1], [0, 0, 1, 1], [], []>} : vector<2x64xf32>, vector<64x256xf32>, vector<2x256xf32> -> vector<2x256xf32>
    %100 = arith.addf %98, %99 : vector<2x256xf32>
    %101 = arith.negf %100 : vector<2x256xf32>
    %102 = math.exp %101 : vector<2x256xf32>
    %cst_19 = arith.constant 1.000000e+00 : f32
    %103 = vector.broadcast %cst_19 : f32 to vector<2x256xf32>
    %104 = arith.addf %103, %102 : vector<2x256xf32>
    %105 = arith.divf %103, %104 : vector<2x256xf32>
    %106 = math.tanh %100 : vector<2x256xf32>
    %107 = vector.extract_strided_slice %105 {offsets = [0, 0], sizes = [2, 64], strides = [1, 1]} : vector<2x256xf32> to vector<2x64xf32>
    %108 = vector.extract_strided_slice %105 {offsets = [0, 64], sizes = [2, 64], strides = [1, 1]} : vector<2x256xf32> to vector<2x64xf32>
    %109 = vector.extract_strided_slice %106 {offsets = [0, 128], sizes = [2, 64], strides = [1, 1]} : vector<2x256xf32> to vector<2x64xf32>
    %110 = vector.extract_strided_slice %105 {offsets = [0, 192], sizes = [2, 64], strides = [1, 1]} : vector<2x256xf32> to vector<2x64xf32>
    %111 = arith.mulf %108, %95 : vector<2x64xf32>
    %112 = arith.mulf %107, %109 : vector<2x64xf32>
    %113 = arith.addf %111, %112 : vector<2x64xf32>
    %114 = math.tanh %113 : vector<2x64xf32>
    %115 = arith.mulf %110, %114 : vector<2x64xf32>
    %116 = vector.extract_strided_slice %5 {offsets = [12, 0], sizes = [2, 256], strides = [1, 1]} : vector<16x256xf32> to vector<2x256xf32>
    %cst_20 = arith.constant dense<0.000000e+00> : vector<2x256xf32>
    %117 = tpu.matmul %115, %1, %cst_20 {dimension_numbers = #tpu.dot_dimension_numbers<[1], [0], [0], [1], [0, 0, 1, 1], [], []>} : vector<2x64xf32>, vector<64x256xf32>, vector<2x256xf32> -> vector<2x256xf32>
    %118 = arith.addf %116, %117 : vector<2x256xf32>
    %119 = arith.negf %118 : vector<2x256xf32>
    %120 = math.exp %119 : vector<2x256xf32>
    %cst_21 = arith.constant 1.000000e+00 : f32
    %121 = vector.broadcast %cst_21 : f32 to vector<2x256xf32>
    %122 = arith.addf %121, %120 : vector<2x256xf32>
    %123 = arith.divf %121, %122 : vector<2x256xf32>
    %124 = math.tanh %118 : vector<2x256xf32>
    %125 = vector.extract_strided_slice %123 {offsets = [0, 0], sizes = [2, 64], strides = [1, 1]} : vector<2x256xf32> to vector<2x64xf32>
    %126 = vector.extract_strided_slice %123 {offsets = [0, 64], sizes = [2, 64], strides = [1, 1]} : vector<2x256xf32> to vector<2x64xf32>
    %127 = vector.extract_strided_slice %124 {offsets = [0, 128], sizes = [2, 64], strides = [1, 1]} : vector<2x256xf32> to vector<2x64xf32>
    %128 = vector.extract_strided_slice %123 {offsets = [0, 192], sizes = [2, 64], strides = [1, 1]} : vector<2x256xf32> to vector<2x64xf32>
    %129 = arith.mulf %126, %113 : vector<2x64xf32>
    %130 = arith.mulf %125, %127 : vector<2x64xf32>
    %131 = arith.addf %129, %130 : vector<2x64xf32>
    %132 = math.tanh %131 : vector<2x64xf32>
    %133 = arith.mulf %128, %132 : vector<2x64xf32>
    %134 = vector.extract_strided_slice %5 {offsets = [14, 0], sizes = [2, 256], strides = [1, 1]} : vector<16x256xf32> to vector<2x256xf32>
    %cst_22 = arith.constant dense<0.000000e+00> : vector<2x256xf32>
    %135 = tpu.matmul %133, %1, %cst_22 {dimension_numbers = #tpu.dot_dimension_numbers<[1], [0], [0], [1], [0, 0, 1, 1], [], []>} : vector<2x64xf32>, vector<64x256xf32>, vector<2x256xf32> -> vector<2x256xf32>
    %136 = arith.addf %134, %135 : vector<2x256xf32>
    %137 = arith.negf %136 : vector<2x256xf32>
    %138 = math.exp %137 : vector<2x256xf32>
    %cst_23 = arith.constant 1.000000e+00 : f32
    %139 = vector.broadcast %cst_23 : f32 to vector<2x256xf32>
    %140 = arith.addf %139, %138 : vector<2x256xf32>
    %141 = arith.divf %139, %140 : vector<2x256xf32>
    %142 = math.tanh %136 : vector<2x256xf32>
    %143 = vector.extract_strided_slice %141 {offsets = [0, 0], sizes = [2, 64], strides = [1, 1]} : vector<2x256xf32> to vector<2x64xf32>
    %144 = vector.extract_strided_slice %141 {offsets = [0, 64], sizes = [2, 64], strides = [1, 1]} : vector<2x256xf32> to vector<2x64xf32>
    %145 = vector.extract_strided_slice %142 {offsets = [0, 128], sizes = [2, 64], strides = [1, 1]} : vector<2x256xf32> to vector<2x64xf32>
    %146 = vector.extract_strided_slice %141 {offsets = [0, 192], sizes = [2, 64], strides = [1, 1]} : vector<2x256xf32> to vector<2x64xf32>
    %147 = arith.mulf %144, %131 : vector<2x64xf32>
    %148 = arith.mulf %143, %145 : vector<2x64xf32>
    %149 = arith.addf %147, %148 : vector<2x64xf32>
    %150 = math.tanh %149 : vector<2x64xf32>
    %151 = arith.mulf %146, %150 : vector<2x64xf32>
    %cst_24 = arith.constant dense<0.000000e+00> : vector<2x256xf32>
    %152 = tpu.matmul %151, %2, %cst_24 {dimension_numbers = #tpu.dot_dimension_numbers<[1], [0], [0], [1], [0, 0, 1, 1], [], []>} : vector<2x64xf32>, vector<64x256xf32>, vector<2x256xf32> -> vector<2x256xf32>
    %153 = vector.broadcast %3 : vector<1x256xf32> to vector<2x256xf32>
    %154 = arith.addf %152, %153 : vector<2x256xf32>
    %155 = vector.extract_strided_slice %154 {offsets = [0, 0], sizes = [2, 16], strides = [1, 1]} : vector<2x256xf32> to vector<2x16xf32>
    %156 = vector.extract_strided_slice %154 {offsets = [0, 16], sizes = [2, 16], strides = [1, 1]} : vector<2x256xf32> to vector<2x16xf32>
    %cst_25 = arith.constant 5.000000e-01 : f32
    %157 = vector.broadcast %cst_25 : f32 to vector<2x16xf32>
    %158 = arith.mulf %156, %157 : vector<2x16xf32>
    %159 = math.exp %158 : vector<2x16xf32>
    %c0_26 = arith.constant 0 : index
    %c0_27 = arith.constant 0 : index
    %160 = vector.load %arg2[%c0_26, %c0_27] : memref<2x16xf32, #tpu.memory_space<vmem>>, vector<2x16xf32>
    %161 = arith.mulf %159, %160 : vector<2x16xf32>
    %162 = arith.addf %155, %161 : vector<2x16xf32>
    %163 = tpu.concatenate %162, %155, %156 in 1 : vector<2x16xf32>, vector<2x16xf32>, vector<2x16xf32> -> vector<2x48xf32>
    %c0_28 = arith.constant 0 : index
    %c0_29 = arith.constant 0 : index
    %164 = vector.load %arg3[%c0_28, %c0_29] : memref<2x48xf32, #tpu.memory_space<vmem>>, vector<2x48xf32>
    tpu.vector_store %arg3[%c0_28, %c0_29], %163 {strides = array<i32>} : memref<2x48xf32, #tpu.memory_space<vmem>>, vector<2x48xf32>,
    return
  }
}

</mosaic_0001>

<bundles_post_ra>
// kernel: tpu_custom_call.1
= control target key start
LH: loop header
LB: loop body
LE: loop exit
PB: predicated region body
PF: predicated region fallthrough
CT: control target
= control target key end

     0   :  { %8 = vsyncpa [#allocation3], 0  ;;  %s1560_s0 = inlined_call_operand.hbm [shape: f32[16,16], index: 0, kind: input, shape index: {}]   ;;  %s1561_s1 = inlined_call_operand.hbm [shape: f32[152,256], index: 1, kind: input, shape index: {}]   ;;  %s1562_s2 = inlined_call_operand.hbm [shape: f32[2,16], index: 2, kind: input, shape index: {}]   ;;  %s1563_s3 = inlined_call_operand.hbm [shape: f32[2,48], index: 3, kind: output, shape index: {}]  }
   0x1   :  { %9 = vsyncpa [#allocation6], 0  ;;  %s28_s14 = sshll.u32 %s1561_s1, 4  ;;  %s29_s14 = int_to_ptr.hbm [resolvable:$true] %s28_s14 }
   0x2   :  { %10 = vsyncpa [#allocation4], 0  ;;  %s1282_s15 = smov [#allocation5]   ;;  %s15_s19 = sshll.u32 %s1560_s0, 4  ;;  %s16_s19 = int_to_ptr.hbm [resolvable:$true] %s15_s19 }
   0x3   :  { %s30_s16 = sshll.u32 %s1282_s15, 4  ;;  %s1283_s20 = smov 256   ;;  %s31_s16 = int_to_ptr.vmem [resolvable:$true] %s30_s16 }
   0x4   :  { %s1284_s21 = smov 16   ;;  %s1285_s22 = smov [#allocation2]  }
   0x5   :  { %36 = dma.hbm_to_vmem [thread:$0]  %s29_s14, 4864, %s31_s16, [#allocation6], %s1283_s20, %s1283_s20, %s1284_s21  }
   0x6   :  { %s17_s23 = sshll.u32 %s1285_s22, 4  ;;  %s1286_s24 = smov 128   ;;  %s18_s23 = int_to_ptr.vmem [resolvable:$true] %s17_s23 }
   0x7   :  { %s1287_s25 = smov 8   ;;  %s42_s27 = sshll.u32 %s1562_s2, 4  ;;  %s43_s27 = int_to_ptr.hbm [resolvable:$true] %s42_s27 }
   0x8   :  { %23 = dma.hbm_to_vmem [thread:$0]  %s16_s19, 256, %s18_s23, [#allocation3], %s1286_s24, %s1286_s24, %s1287_s25  }
   0x9   :  { %s1288_s28 = smov [#allocation7]  }
   0xa   :  { %s44_s29 = sshll.u32 %s1288_s28, 4  ;;  %s45_s29 = int_to_ptr.vmem [resolvable:$true] %s44_s29 }
   0xb   :  { %47 = dma.hbm_to_vmem [thread:$0]  %s43_s27, 32, %s45_s29, [#allocation6]  }
   0xc   :  { %1276 = dma.done.wait [#allocation3], 256  }
   0xd   :  { %1277 = vsyncadd [#allocation3], 4294967040 }
   0xe   :  { %1278 = dma.done.wait [#allocation6], 4896  }
   0xf   :  { %1279 = vsyncadd [#allocation6], 4294962400  ;;  %v1323_v0 = vld [vmem:[#allocation5 + $0x90] sm:$0xff]  ;;  %v1325_v1 = vld [vmem:[#allocation5 + $0x80] sm:$0xff]  ;;  %vm92_vm0 = vcmask 130048   ;;  %v1289_v21 = vmov 0.0  }
  0x10   :  { %157 = vmatpush.msra.mxu2 %v1323_v0  ;;  %v1328_v2 = vld [vmem:[#allocation5 + $0x98] sm:$0xff]  ;;  %v1330_v3 = vld [vmem:[#allocation5 + $0x70] sm:$0xff]  ;;  %v1333_v4 = vld [vmem:[#allocation5 + $0x88] sm:$0xff]  ;;  %s1290_s0 = smov 64   ;;  %vm145_vm9 = vcmask 523264   ;;  %s1291_s2 = smov 112  }
  0x11   :  { %177 = vmatpush.msra.mxu3 %v1328_v2  ;;  %v1336_v5 = vld [vmem:[#allocation5 + $0x78] sm:$0xff]  ;;  %v1338_v6 = vld [vmem:[#allocation5 + $0x60] sm:$0xff]  ;;  %v62_v7 = vld [vmem:[#allocation5 + $0x10] sm:$0xff]  ;;  %s1292_s30 = smov [#allocation8]   ;;  %s1025_s7 = sshll.u32 %s1563_s3, 4  ;;  %s1026_s7 = int_to_ptr.hbm [resolvable:$true] %s1025_s7 }
  0x12   :  { %158 = vmatpush.msra.mxu2 %v1325_v1  ;;  %v1342_v8 = vld [vmem:[#allocation5 + $0x68] sm:$0xff]  ;;  %113 = vmatpush.msra.mxu0 %v62_v7  ;;  %v60_v9 = vld [vmem:[#allocation5] sm:$0xff]  ;;  %v90_v10 = vld [vmem:[#allocation2] sm:$0xff]  ;;  %s1023_s4 = sshll.u32 %s1292_s30, 4  ;;  %s1024_s4 = int_to_ptr.vmem [resolvable:$true] %s1023_s4 }
  0x13   :  { %178 = vmatpush.msra.mxu3 %v1333_v4  ;;  %v1344_v11 = vld [vmem:[#allocation5 + $0x50] sm:$0xff]  ;;  %v63_v12 = vld [vmem:[#allocation5 + $0x18] sm:$0xff]  ;;  %v1350_v14 = vld [vmem:[#allocation5 + $0x40] sm:$0xff] }
  0x14   :  { %159 = vmatpush.msra.mxu2 %v1330_v3  ;;  %v1348_v13 = vld [vmem:[#allocation5 + $0x58] sm:$0xff]  ;;  %114 = vmatpush.msra.mxu0 %v60_v9  ;;  %v61_v15 = vld [vmem:[#allocation5 + $0x8] sm:$0xff]  ;;  %v1357_v17 = vld [vmem:[#allocation5 + $0x30] sm:$0xff] }
  0x15   :  { %179 = vmatpush.msra.mxu3 %v1336_v5  ;;  %1036 = vmatmul.msk.f32.vlgmr.msra.gmra.mxu0 %vm92_vm0, %v90_v10  ;;  %v1355_v16 = vld [vmem:[#allocation5 + $0x48] sm:$0xff]  ;;  %v1362_v18 = vld [vmem:[#allocation5 + $0x38] sm:$0xff]  ;;  %v1364_v19 = vld [vmem:[#allocation5 + $0x20] sm:$0xff] }
  0x16   :  { %160 = vmatpush.msra.mxu2 %v1338_v6  ;;  %136 = vmatpush.msra.mxu1 %v63_v12  ;;  %v1369_v20 = vld [vmem:[#allocation5 + $0x28] sm:$0xff]  ;;  %v91_v46 = vld [vmem:[#allocation2 + $0x8] sm:$0xff] }
  0x17   :  { %180 = vmatpush.msra.mxu3 %v1342_v8  ;;  %252 = vmatpush.msrb.mxu0 %v1323_v0 }
  0x18   :  { %161 = vmatpush.msra.mxu2 %v1344_v11  ;;  %137 = vmatpush.msra.mxu1 %v61_v15 }
  0x19   :  { %181 = vmatpush.msra.mxu3 %v1348_v13  ;;  %1038 = vmatmul.msk.f32.vlgmr.msra.gmra.mxu1 %vm92_vm0, %v90_v10 }
  0x1a   :  { %162 = vmatpush.msra.mxu2 %v1350_v14  ;;  %272 = vmatpush.msrb.mxu1 %v1328_v2 }
  0x1b   :  { %182 = vmatpush.msra.mxu3 %v1355_v16  ;;  %253 = vmatpush.msrb.mxu0 %v1325_v1 }
  0x1c   :  { %163 = vmatpush.msra.mxu2 %v1357_v17  ;;  %273 = vmatpush.msrb.mxu1 %v1333_v4 }
  0x1d   :  { %183 = vmatpush.msra.mxu3 %v1362_v18  ;;  %254 = vmatpush.msrb.mxu0 %v1330_v3 }
  0x1e   :  { %164 = vmatpush.msra.mxu2 %v1364_v19  ;;  %274 = vmatpush.msrb.mxu1 %v1336_v5 }
  0x1f   :  { %165 = vmatmul.f32.vlgmr.msra.gmra.mxu2 %v1289_v21  ;;  %184 = vmatpush.msra.mxu3 %v1369_v20 }
  0x20   :  { %185 = vmatmul.f32.vlgmr.msra.gmra.mxu3 %v1289_v21  ;;  %357 = vmatpush.msrb.mxu2 %v1323_v0 }
  0x21   :  { %255 = vmatpush.msrb.mxu0 %v1338_v6  ;;  %377 = vmatpush.msrb.mxu3 %v1328_v2 }
  0x22   :  { %275 = vmatpush.msrb.mxu1 %v1342_v8  ;;  %358 = vmatpush.msrb.mxu2 %v1325_v1 }
  0x23   :  { %256 = vmatpush.msrb.mxu0 %v1344_v11  ;;  %378 = vmatpush.msrb.mxu3 %v1333_v4 }
  0x24   :  { %276 = vmatpush.msrb.mxu1 %v1348_v13  ;;  %359 = vmatpush.msrb.mxu2 %v1330_v3 }
  0x25   :  { %257 = vmatpush.msrb.mxu0 %v1350_v14  ;;  %379 = vmatpush.msrb.mxu3 %v1336_v5 }
  0x26   :  { %277 = vmatpush.msrb.mxu1 %v1355_v16  ;;  %360 = vmatpush.msrb.mxu2 %v1338_v6 }
  0x27   :  { %258 = vmatpush.msrb.mxu0 %v1357_v17  ;;  %380 = vmatpush.msrb.mxu3 %v1342_v8 }
  0x28   :  { %278 = vmatpush.msrb.mxu1 %v1362_v18  ;;  %361 = vmatpush.msrb.mxu2 %v1344_v11 }
  0x29   :  { %259 = vmatpush.msrb.mxu0 %v1364_v19  ;;  %381 = vmatpush.msrb.mxu3 %v1348_v13 }
  0x2a   :  { %279 = vmatpush.msrb.mxu1 %v1369_v20  ;;  %362 = vmatpush.msrb.mxu2 %v1350_v14 }
  0x2b   :  { %382 = vmatpush.msrb.mxu3 %v1355_v16  ;;  %462 = vmatpush.msra.mxu0 %v1323_v0 }
  0x2c   :  { %363 = vmatpush.msrb.mxu2 %v1357_v17  ;;  %482 = vmatpush.msra.mxu1 %v1328_v2 }
  0x2d   :  { %383 = vmatpush.msrb.mxu3 %v1362_v18  ;;  %463 = vmatpush.msra.mxu0 %v1325_v1 }
  0x2e   :  { %364 = vmatpush.msrb.mxu2 %v1364_v19  ;;  %483 = vmatpush.msra.mxu1 %v1333_v4 }
  0x2f   :  { %384 = vmatpush.msrb.mxu3 %v1369_v20  ;;  %464 = vmatpush.msra.mxu0 %v1330_v3 }
  0x30   :  { %484 = vmatpush.msra.mxu1 %v1336_v5  ;;  %567 = vmatpush.msra.mxu2 %v1323_v0 }
  0x31   :  { %465 = vmatpush.msra.mxu0 %v1338_v6  ;;  %587 = vmatpush.msra.mxu3 %v1328_v2 }
  0x32   :  { %485 = vmatpush.msra.mxu1 %v1342_v8  ;;  %568 = vmatpush.msra.mxu2 %v1325_v1 }
  0x33   :  { %466 = vmatpush.msra.mxu0 %v1344_v11  ;;  %588 = vmatpush.msra.mxu3 %v1333_v4 }
  0x34   :  { %486 = vmatpush.msra.mxu1 %v1348_v13  ;;  %569 = vmatpush.msra.mxu2 %v1330_v3 }
  0x35   :  { %467 = vmatpush.msra.mxu0 %v1350_v14  ;;  %589 = vmatpush.msra.mxu3 %v1336_v5 }
  0x36   :  { %487 = vmatpush.msra.mxu1 %v1355_v16  ;;  %570 = vmatpush.msra.mxu2 %v1338_v6 }
  0x37   :  { %468 = vmatpush.msra.mxu0 %v1357_v17  ;;  %590 = vmatpush.msra.mxu3 %v1342_v8 }
  0x38   :  { %488 = vmatpush.msra.mxu1 %v1362_v18  ;;  %571 = vmatpush.msra.mxu2 %v1344_v11 }
  0x39   :  { %469 = vmatpush.msra.mxu0 %v1364_v19  ;;  %591 = vmatpush.msra.mxu3 %v1348_v13 }
  0x3a   :  { %489 = vmatpush.msra.mxu1 %v1369_v20  ;;  %572 = vmatpush.msra.mxu2 %v1350_v14 }
  0x3b   :  { %592 = vmatpush.msra.mxu3 %v1355_v16  ;;  %1037 = vmatmul.msk.f32.gmra.mxu0 %vm92_vm0, %v91_v46 }
  0x3c   :  { %573 = vmatpush.msra.mxu2 %v1357_v17  ;;  %1039 = vmatmul.msk.f32.gmra.mxu1 %vm92_vm0, %v91_v46 }
  0x3d   :  { %593 = vmatpush.msra.mxu3 %v1362_v18 }
  0x3e   :  { %574 = vmatpush.msra.mxu2 %v1364_v19 }
  0x3f   :  { %594 = vmatpush.msra.mxu3 %v1369_v20 }
  0x92   :  { %v1437_v22 = vpop.f32.mrf.mxu0 }
  0x96   :  { %v1440_v28 = vpop.f32.mrf.mxu1 }
  0xa2   :  { %v166_v23 = vpop.f32.mrf.mxu2 }
  0xa3   :  { %v189_v24 = vadd.f32 %v166_v23, %v1437_v22  ;;  %v186_v29 = vpop.f32.mrf.mxu3 }
  0xa4   :  { %v190_v31 = vadd.f32 %v186_v29, %v1440_v28 }
  0xa5   :  { %v1040_v25 = vmul.f32 -1.442695, %v189_v24 }
  0xa6   :  { %v1041_v43 = vmul.f32 -1.442695, %v190_v31 }
  0xa7   :  { %1082 = vpow2.f32 %v1040_v25 }
  0xad   :  { %v1083_v26 = vpop.eup %1082 }
  0xae   :  { %v197_v27 = vadd.f32 1.0, %v1083_v26 }
  0xb0   :  { %1084 = vrcp.f32 %v197_v27  ;;  %v210_v34 = vand.u32 2147483648, %v197_v27  ;;  %v208_v36 = vand.u32 2147483647, %v197_v27  ;;  %vm204_vm2 = vweird.f32 %v197_v27 }
  0xb1   :  { %1086 = vtanh.f32 %v190_v31 }
  0xb2   :  { %v211_v39 = vor.u32 1.1754944e-38, %v210_v34  ;;  %vm209_vm4 = vcmp.eq.f32.partialorder %v208_v36, 8.507059e+37  ;;  %1088 = vpow2.f32 %v1041_v43 }
  0xb6   :  { %v1085_v30 = vpop.eup %1084 }
  0xb7   :  { %v200_v32 = vmul.f32 %v1085_v30, %v197_v27  ;;  %vm205_vm1 = vweird.f32 %v1085_v30  ;;  %v1087_v38 = vpop.eup %1086 }
  0xb8   :  { %vm206_vm3 = vmor %vm204_vm2, %vm205_vm1  ;;  %v1089_v44 = vpop.eup %1088  ;;  %v1468_v63 = vpop.f32.mrf.mxu0 }
  0xb9   :  { %v201_v33 = vsub.f32 1.0, %v200_v32  ;;  %v198_v45 = vadd.f32 1.0, %v1089_v44  ;;  %v1471_v12 = vpop.f32.mrf.mxu1 }
  0xbb   :  { %v202_v35 = vmul.f32 %v1085_v30, %v201_v33  ;;  %1090 = vrcp.f32 %v198_v45  ;;  %vm219_vm5 = vweird.f32 %v198_v45  ;;  %v225_v54 = vand.u32 2147483648, %v198_v45 }
  0xbc   :  { %v223_v56 = vand.u32 2147483647, %v198_v45 }
  0xbd   :  { %v203_v37 = vadd.f32 %v1085_v30, %v202_v35  ;;  %v226_v57 = vor.u32 1.1754944e-38, %v225_v54 }
  0xbe   :  { %vm224_vm8 = vcmp.eq.f32.partialorder %v223_v56, 8.507059e+37 }
  0xbf   :  { %v207_v40 = vsel %vm206_vm3, %v1085_v30, %v203_v37 }
  0xc0   :  { %v212_v41 = vsel %vm209_vm4, %v211_v39, %v207_v40 }
  0xc1   :  { %v231_v42 = vmul.f32 %v1087_v38, %v212_v41  ;;  %v1091_v47 = vpop.eup %1090  ;;  %v230_v51 = vmul.f32 0.0, %v212_v41 }
  0xc2   :  { %v215_v48 = vmul.f32 %v1091_v47, %v198_v45  ;;  %vm220_vm6 = vweird.f32 %v1091_v47 }
  0xc3   :  { %233 = vrot.lane.b32.xlu0 %v231_v42, %s1290_s0  ;;  %vm221_vm7 = vmor %vm219_vm5, %vm220_vm6 }
  0xc4   :  { %v216_v49 = vsub.f32 1.0, %v215_v48 }
  0xc6   :  { %v217_v50 = vmul.f32 %v1091_v47, %v216_v49 }
  0xc8   :  { %v218_v55 = vadd.f32 %v1091_v47, %v217_v50 }
  0xca   :  { %v222_v58 = vsel %vm221_vm7, %v1091_v47, %v218_v55 }
  0xcb   :  { %v227_v60 = vsel %vm224_vm8, %v226_v57, %v222_v58 }
 0x135   :  { %v234_v52 = vpop.permute.xlu0 %233 }
 0x136   :  { %v1446_v53 = vadd.f32 %v234_v52, %v230_v51 }
 0x138   :  { %1092 = vtanh.f32 %v1446_v53  ;;  %v332_v36 = vrot.slane %v1446_v53, 6 }
 0x13e   :  { %v1093_v59 = vpop.eup %1092 }
 0x13f   :  { %v238_v61 = vmul.f32 %v1093_v59, %v227_v60 }
 0x141   :  { %240 = vrot.lane.b32.xlu0 %v238_v61, %s1290_s0 }
 0x1b3   :  { %v241_v62 = vpop.permute.xlu0 %240 }
 0x1b4   :  { %1042 = vmatmul.msk.f32.vlgmr.msrb.gmra.mxu0 %vm145_vm9, %v241_v62  ;;  %1043 = vmatmul.msk.f32.vlgmr.msrb.gmra.mxu1 %vm145_vm9, %v241_v62 }
 0x1b5   :  { %665 = vmatpush.msrb.mxu0 %v1323_v0  ;;  %685 = vmatpush.msrb.mxu1 %v1328_v2 }
 0x1b7   :  { %666 = vmatpush.msrb.mxu0 %v1325_v1  ;;  %686 = vmatpush.msrb.mxu1 %v1333_v4 }
 0x1b9   :  { %667 = vmatpush.msrb.mxu0 %v1330_v3  ;;  %687 = vmatpush.msrb.mxu1 %v1336_v5 }
 0x1bb   :  { %668 = vmatpush.msrb.mxu0 %v1338_v6  ;;  %688 = vmatpush.msrb.mxu1 %v1342_v8 }
 0x1bd   :  { %669 = vmatpush.msrb.mxu0 %v1344_v11  ;;  %689 = vmatpush.msrb.mxu1 %v1348_v13 }
 0x1bf   :  { %670 = vmatpush.msrb.mxu0 %v1350_v14  ;;  %690 = vmatpush.msrb.mxu1 %v1355_v16 }
 0x1c1   :  { %671 = vmatpush.msrb.mxu0 %v1357_v17  ;;  %691 = vmatpush.msrb.mxu1 %v1362_v18 }
 0x1c3   :  { %672 = vmatpush.msrb.mxu0 %v1364_v19  ;;  %692 = vmatpush.msrb.mxu1 %v1369_v20 }
 0x231   :  { %v261_v7 = vpop.f32.mrf.mxu0  ;;  %v281_v24 = vpop.f32.mrf.mxu1 }
 0x232   :  { %v286_v9 = vrot.slane %v261_v7, 6  ;;  %v287_v25 = vrot.slane %v281_v24, 6 }
 0x234   :  { %v290_v10 = vadd.f32 %v286_v9, %v1437_v22  ;;  %v291_v27 = vadd.f32 %v287_v25, %v1440_v28 }
 0x236   :  { %v1044_v15 = vmul.f32 -1.442695, %v290_v10  ;;  %v1045_v42 = vmul.f32 -1.442695, %v291_v27 }
 0x238   :  { %1094 = vpow2.f32 %v1044_v15 }
 0x23e   :  { %v1095_v21 = vpop.eup %1094 }
 0x23f   :  { %v298_v23 = vadd.f32 1.0, %v1095_v21 }
 0x241   :  { %1096 = vrcp.f32 %v298_v23  ;;  %v311_v31 = vand.u32 2147483648, %v298_v23  ;;  %v309_v33 = vand.u32 2147483647, %v298_v23  ;;  %vm305_vm11 = vweird.f32 %v298_v23 }
 0x242   :  { %1098 = vtanh.f32 %v291_v27 }
 0x243   :  { %v312_v35 = vor.u32 1.1754944e-38, %v311_v31  ;;  %vm310_vm13 = vcmp.eq.f32.partialorder %v309_v33, 8.507059e+37  ;;  %1100 = vpow2.f32 %v1045_v42 }
 0x247   :  { %v1097_v26 = vpop.eup %1096 }
 0x248   :  { %v301_v29 = vmul.f32 %v1097_v26, %v298_v23  ;;  %vm306_vm10 = vweird.f32 %v1097_v26  ;;  %v1099_v38 = vpop.eup %1098 }
 0x249   :  { %vm307_vm12 = vmor %vm305_vm11, %vm306_vm10  ;;  %v1101_v43 = vpop.eup %1100 }
 0x24a   :  { %v302_v30 = vsub.f32 1.0, %v301_v29  ;;  %v299_v44 = vadd.f32 1.0, %v1101_v43 }
 0x24c   :  { %v303_v32 = vmul.f32 %v1097_v26, %v302_v30  ;;  %1102 = vrcp.f32 %v299_v44  ;;  %v326_v52 = vand.u32 2147483648, %v299_v44  ;;  %vm320_vm15 = vweird.f32 %v299_v44 }
 0x24d   :  { %v324_v53 = vand.u32 2147483647, %v299_v44 }
 0x24e   :  { %v304_v34 = vadd.f32 %v1097_v26, %v303_v32  ;;  %v327_v55 = vor.u32 1.1754944e-38, %v326_v52 }
 0x24f   :  { %vm325_vm2 = vcmp.eq.f32.partialorder %v324_v53, 8.507059e+37 }
 0x250   :  { %v308_v37 = vsel %vm307_vm12, %v1097_v26, %v304_v34 }
 0x251   :  { %v313_v39 = vsel %vm310_vm13, %v312_v35, %v308_v37 }
 0x252   :  { %v335_v40 = vmul.f32 %v1099_v38, %v313_v39  ;;  %v334_v41 = vmul.f32 %v332_v36, %v313_v39  ;;  %v1103_v45 = vpop.eup %1102 }
 0x253   :  { %v316_v46 = vmul.f32 %v1103_v45, %v299_v44  ;;  %vm321_vm14 = vweird.f32 %v1103_v45 }
 0x254   :  { %337 = vrot.lane.b32.xlu1 %v335_v40, %s1290_s0  ;;  %vm322_vm1 = vmor %vm320_vm15, %vm321_vm14 }
 0x255   :  { %v317_v47 = vsub.f32 1.0, %v316_v46 }
 0x257   :  { %v318_v48 = vmul.f32 %v1103_v45, %v317_v47 }
 0x259   :  { %v319_v51 = vadd.f32 %v1103_v45, %v318_v48 }
 0x25b   :  { %v323_v54 = vsel %vm322_vm1, %v1103_v45, %v319_v51 }
 0x25c   :  { %v328_v57 = vsel %vm325_vm2, %v327_v55, %v323_v54 }
 0x2c6   :  { %v338_v49 = vpop.permute.xlu1 %337 }
 0x2c7   :  { %v1476_v50 = vadd.f32 %v338_v49, %v334_v41 }
 0x2c9   :  { %1104 = vtanh.f32 %v1476_v50  ;;  %v437_v34 = vrot.slane %v1476_v50, 6 }
 0x2cf   :  { %v1105_v56 = vpop.eup %1104 }
 0x2d0   :  { %v342_v58 = vmul.f32 %v1105_v56, %v328_v57 }
 0x2d2   :  { %v344_v59 = vrot.slane %v342_v58, 2 }
 0x2d4   :  { %345 = vrot.lane.b32.xlu1 %v344_v59, %s1290_s0 }
 0x346   :  { %v346_v60 = vpop.permute.xlu1 %345 }
 0x347   :  { %1046 = vmatmul.msk.f32.vlgmr.msrb.gmra.mxu2 %vm145_vm9, %v346_v60  ;;  %1047 = vmatmul.msk.f32.vlgmr.msrb.gmra.mxu3 %vm145_vm9, %v346_v60 }
 0x348   :  { %770 = vmatpush.msrb.mxu2 %v1323_v0  ;;  %790 = vmatpush.msrb.mxu3 %v1328_v2 }
 0x34a   :  { %771 = vmatpush.msrb.mxu2 %v1325_v1  ;;  %791 = vmatpush.msrb.mxu3 %v1333_v4 }
 0x34c   :  { %772 = vmatpush.msrb.mxu2 %v1330_v3  ;;  %792 = vmatpush.msrb.mxu3 %v1336_v5 }
 0x34e   :  { %773 = vmatpush.msrb.mxu2 %v1338_v6  ;;  %793 = vmatpush.msrb.mxu3 %v1342_v8 }
 0x350   :  { %774 = vmatpush.msrb.mxu2 %v1344_v11  ;;  %794 = vmatpush.msrb.mxu3 %v1348_v13 }
 0x352   :  { %775 = vmatpush.msrb.mxu2 %v1350_v14  ;;  %795 = vmatpush.msrb.mxu3 %v1355_v16 }
 0x354   :  { %776 = vmatpush.msrb.mxu2 %v1357_v17  ;;  %796 = vmatpush.msrb.mxu3 %v1362_v18 }
 0x356   :  { %777 = vmatpush.msrb.mxu2 %v1364_v19  ;;  %797 = vmatpush.msrb.mxu3 %v1369_v20 }
 0x3ca   :  { %v366_v61 = vpop.f32.mrf.mxu2  ;;  %v386_v21 = vpop.f32.mrf.mxu3 }
 0x3cb   :  { %v391_v62 = vrot.slane %v366_v61, 4  ;;  %v392_v23 = vrot.slane %v386_v21, 4 }
 0x3cd   :  { %v395_v7 = vadd.f32 %v391_v62, %v1437_v22  ;;  %v396_v25 = vadd.f32 %v392_v23, %v1440_v28 }
 0x3cf   :  { %v1048_v9 = vmul.f32 -1.442695, %v395_v7  ;;  %v1049_v40 = vmul.f32 -1.442695, %v396_v25 }
 0x3d1   :  { %1106 = vpow2.f32 %v1048_v9 }
 0x3d7   :  { %v1107_v10 = vpop.eup %1106 }
 0x3d8   :  { %v403_v15 = vadd.f32 1.0, %v1107_v10 }
 0x3da   :  { %1108 = vrcp.f32 %v403_v15  ;;  %v416_v29 = vand.u32 2147483648, %v403_v15  ;;  %v414_v31 = vand.u32 2147483647, %v403_v15  ;;  %vm410_vm4 = vweird.f32 %v403_v15 }
 0x3db   :  { %1110 = vtanh.f32 %v396_v25 }
 0x3dc   :  { %v417_v33 = vor.u32 1.1754944e-38, %v416_v29  ;;  %vm415_vm6 = vcmp.eq.f32.partialorder %v414_v31, 8.507059e+37  ;;  %1112 = vpow2.f32 %v1049_v40 }
 0x3e0   :  { %v1109_v24 = vpop.eup %1108 }
 0x3e1   :  { %v406_v26 = vmul.f32 %v1109_v24, %v403_v15  ;;  %vm411_vm3 = vweird.f32 %v1109_v24  ;;  %v1111_v36 = vpop.eup %1110 }
 0x3e2   :  { %vm412_vm5 = vmor %vm410_vm4, %vm411_vm3  ;;  %v1113_v41 = vpop.eup %1112 }
 0x3e3   :  { %v407_v27 = vsub.f32 1.0, %v406_v26  ;;  %v404_v42 = vadd.f32 1.0, %v1113_v41 }
 0x3e5   :  { %v408_v30 = vmul.f32 %v1109_v24, %v407_v27  ;;  %1114 = vrcp.f32 %v404_v42  ;;  %v431_v50 = vand.u32 2147483648, %v404_v42  ;;  %vm425_vm8 = vweird.f32 %v404_v42 }
 0x3e6   :  { %v429_v51 = vand.u32 2147483647, %v404_v42 }
 0x3e7   :  { %v409_v32 = vadd.f32 %v1109_v24, %v408_v30  ;;  %v432_v53 = vor.u32 1.1754944e-38, %v431_v50 }
 0x3e8   :  { %vm430_vm11 = vcmp.eq.f32.partialorder %v429_v51, 8.507059e+37 }
 0x3e9   :  { %v413_v35 = vsel %vm412_vm5, %v1109_v24, %v409_v32 }
 0x3ea   :  { %v418_v37 = vsel %vm415_vm6, %v417_v33, %v413_v35 }
 0x3eb   :  { %v440_v38 = vmul.f32 %v1111_v36, %v418_v37  ;;  %v439_v39 = vmul.f32 %v437_v34, %v418_v37  ;;  %v1115_v43 = vpop.eup %1114 }
 0x3ec   :  { %v421_v44 = vmul.f32 %v1115_v43, %v404_v42  ;;  %vm426_vm7 = vweird.f32 %v1115_v43 }
 0x3ed   :  { %442 = vrot.lane.b32.xlu2 %v440_v38, %s1290_s0  ;;  %vm427_vm10 = vmor %vm425_vm8, %vm426_vm7 }
 0x3ee   :  { %v422_v45 = vsub.f32 1.0, %v421_v44 }
 0x3f0   :  { %v423_v46 = vmul.f32 %v1115_v43, %v422_v45 }
 0x3f2   :  { %v424_v49 = vadd.f32 %v1115_v43, %v423_v46 }
 0x3f4   :  { %v428_v52 = vsel %vm427_vm10, %v1115_v43, %v424_v49 }
 0x3f5   :  { %v433_v55 = vsel %vm430_vm11, %v432_v53, %v428_v52 }
 0x447   :  { %v443_v47 = vpop.permute.xlu2 %442 }
 0x448   :  { %v1502_v48 = vadd.f32 %v443_v47, %v439_v39 }
 0x44a   :  { %1116 = vtanh.f32 %v1502_v48  ;;  %v542_v59 = vrot.slane %v1502_v48, 6 }
 0x450   :  { %v1117_v54 = vpop.eup %1116 }
 0x451   :  { %v447_v56 = vmul.f32 %v1117_v54, %v433_v55 }
 0x453   :  { %v449_v57 = vrot.slane %v447_v56, 4 }
 0x455   :  { %450 = vrot.lane.b32.xlu2 %v449_v57, %s1290_s0 }
 0x4af   :  { %v451_v58 = vpop.permute.xlu2 %450 }
 0x4b0   :  { %1050 = vmatmul.msk.f32.vlgmr.msra.gmra.mxu0 %vm145_vm9, %v451_v58  ;;  %1051 = vmatmul.msk.f32.vlgmr.msra.gmra.mxu1 %vm145_vm9, %v451_v58 }
 0x4b1   :  { %875 = vmatpush.msra.mxu0 %v1323_v0  ;;  %895 = vmatpush.msra.mxu1 %v1328_v2 }
 0x4b3   :  { %876 = vmatpush.msra.mxu0 %v1325_v1  ;;  %896 = vmatpush.msra.mxu1 %v1333_v4 }
 0x4b5   :  { %877 = vmatpush.msra.mxu0 %v1330_v3  ;;  %897 = vmatpush.msra.mxu1 %v1336_v5 }
 0x4b7   :  { %878 = vmatpush.msra.mxu0 %v1338_v6  ;;  %898 = vmatpush.msra.mxu1 %v1342_v8 }
 0x4b9   :  { %879 = vmatpush.msra.mxu0 %v1344_v11  ;;  %899 = vmatpush.msra.mxu1 %v1348_v13 }
 0x4bb   :  { %880 = vmatpush.msra.mxu0 %v1350_v14  ;;  %900 = vmatpush.msra.mxu1 %v1355_v16 }
 0x4bd   :  { %881 = vmatpush.msra.mxu0 %v1357_v17  ;;  %901 = vmatpush.msra.mxu1 %v1362_v18 }
 0x4bf   :  { %882 = vmatpush.msra.mxu0 %v1364_v19  ;;  %902 = vmatpush.msra.mxu1 %v1369_v20 }
 0x52d   :  { %v471_v0 = vpop.f32.mrf.mxu0  ;;  %v491_v6 = vpop.f32.mrf.mxu1 }
 0x52e   :  { %v496_v1 = vrot.slane %v471_v0, 2  ;;  %v497_v8 = vrot.slane %v491_v6, 2 }
 0x530   :  { %v500_v2 = vadd.f32 %v496_v1, %v1437_v22  ;;  %v501_v13 = vadd.f32 %v497_v8, %v1440_v28 }
 0x532   :  { %v1052_v3 = vmul.f32 -1.442695, %v500_v2  ;;  %v1053_v28 = vmul.f32 -1.442695, %v501_v13 }
 0x534   :  { %1118 = vpow2.f32 %v1052_v3 }
 0x53a   :  { %v1119_v4 = vpop.eup %1118 }
 0x53b   :  { %v508_v5 = vadd.f32 1.0, %v1119_v4 }
 0x53d   :  { %1120 = vrcp.f32 %v508_v5  ;;  %v521_v17 = vand.u32 2147483648, %v508_v5  ;;  %v519_v19 = vand.u32 2147483647, %v508_v5  ;;  %vm515_vm13 = vweird.f32 %v508_v5 }
 0x53e   :  { %1122 = vtanh.f32 %v501_v13 }
 0x53f   :  { %v522_v22 = vor.u32 1.1754944e-38, %v521_v17  ;;  %vm520_vm15 = vcmp.eq.f32.partialorder %v519_v19, 8.507059e+37  ;;  %1124 = vpow2.f32 %v1053_v28 }
 0x543   :  { %v1121_v11 = vpop.eup %1120 }
 0x544   :  { %v511_v14 = vmul.f32 %v1121_v11, %v508_v5  ;;  %vm516_vm12 = vweird.f32 %v1121_v11  ;;  %v1123_v61 = vpop.eup %1122 }
 0x545   :  { %vm517_vm14 = vmor %vm515_vm13, %vm516_vm12  ;;  %v1125_v10 = vpop.eup %1124 }
 0x546   :  { %v512_v16 = vsub.f32 1.0, %v511_v14  ;;  %v509_v15 = vadd.f32 1.0, %v1125_v10 }
 0x548   :  { %v513_v18 = vmul.f32 %v1121_v11, %v512_v16  ;;  %1126 = vrcp.f32 %v509_v15  ;;  %v536_v30 = vand.u32 2147483648, %v509_v15  ;;  %vm530_vm2 = vweird.f32 %v509_v15 }
 0x549   :  { %v534_v31 = vand.u32 2147483647, %v509_v15 }
 0x54a   :  { %v514_v20 = vadd.f32 %v1121_v11, %v513_v18  ;;  %v537_v33 = vor.u32 1.1754944e-38, %v536_v30 }
 0x54b   :  { %vm535_vm4 = vcmp.eq.f32.partialorder %v534_v31, 8.507059e+37 }
 0x54c   :  { %v518_v60 = vsel %vm517_vm14, %v1121_v11, %v514_v20 }
 0x54d   :  { %v523_v62 = vsel %vm520_vm15, %v522_v22, %v518_v60 }
 0x54e   :  { %v545_v7 = vmul.f32 %v1123_v61, %v523_v62  ;;  %v544_v9 = vmul.f32 %v542_v59, %v523_v62  ;;  %v1127_v21 = vpop.eup %1126 }
 0x54f   :  { %v526_v23 = vmul.f32 %v1127_v21, %v509_v15  ;;  %vm531_vm1 = vweird.f32 %v1127_v21 }
 0x550   :  { %547 = vrot.lane.b32.xlu0 %v545_v7, %s1290_s0  ;;  %vm532_vm3 = vmor %vm530_vm2, %vm531_vm1 }
 0x551   :  { %v527_v24 = vsub.f32 1.0, %v526_v23 }
 0x553   :  { %v528_v25 = vmul.f32 %v1127_v21, %v527_v24 }
 0x555   :  { %v529_v29 = vadd.f32 %v1127_v21, %v528_v25 }
 0x557   :  { %v533_v32 = vsel %vm532_vm3, %v1127_v21, %v529_v29 }
 0x558   :  { %v538_v35 = vsel %vm535_vm4, %v537_v33, %v533_v32 }
 0x5c2   :  { %v548_v26 = vpop.permute.xlu0 %547 }
 0x5c3   :  { %v550_v27 = vadd.f32 %v548_v26, %v544_v9 }
 0x5c5   :  { %1128 = vtanh.f32 %v550_v27  ;;  %v641_v54 = vrot.slane %v550_v27, 6 }
 0x5cb   :  { %v1129_v34 = vpop.eup %1128 }
 0x5cc   :  { %v552_v36 = vmul.f32 %v1129_v34, %v538_v35 }
 0x5ce   :  { %v554_v37 = vrot.slane %v552_v36, 6 }
 0x5d0   :  { %555 = vrot.lane.b32.xlu1 %v554_v37, %s1290_s0 }
 0x642   :  { %v556_v38 = vpop.permute.xlu1 %555 }
 0x643   :  { %1054 = vmatmul.msk.f32.vlgmr.msra.gmra.mxu2 %vm145_vm9, %v556_v38  ;;  %1055 = vmatmul.msk.f32.vlgmr.msra.gmra.mxu3 %vm145_vm9, %v556_v38 }
 0x6c6   :  { %v576_v39 = vpop.f32.mrf.mxu2  ;;  %v596_v44 = vpop.f32.mrf.mxu3 }
 0x6c7   :  { %v599_v40 = vadd.f32 %v576_v39, %v1468_v63  ;;  %v600_v46 = vadd.f32 %v596_v44, %v1471_v12 }
 0x6c9   :  { %v1056_v41 = vmul.f32 -1.442695, %v599_v40  ;;  %v1057_v1 = vmul.f32 -1.442695, %v600_v46 }
 0x6cb   :  { %1130 = vpow2.f32 %v1056_v41 }
 0x6d1   :  { %v1131_v42 = vpop.eup %1130 }
 0x6d2   :  { %v607_v43 = vadd.f32 1.0, %v1131_v42 }
 0x6d4   :  { %1132 = vrcp.f32 %v607_v43  ;;  %v620_v49 = vand.u32 2147483648, %v607_v43  ;;  %v618_v51 = vand.u32 2147483647, %v607_v43  ;;  %vm614_vm6 = vweird.f32 %v607_v43 }
 0x6d5   :  { %1134 = vtanh.f32 %v600_v46 }
 0x6d6   :  { %v621_v53 = vor.u32 1.1754944e-38, %v620_v49  ;;  %vm619_vm8 = vcmp.eq.f32.partialorder %v618_v51, 8.507059e+37  ;;  %1136 = vpow2.f32 %v1057_v1 }
 0x6da   :  { %v1133_v45 = vpop.eup %1132 }
 0x6db   :  { %v610_v47 = vmul.f32 %v1133_v45, %v607_v43  ;;  %vm615_vm5 = vweird.f32 %v1133_v45  ;;  %v1135_v56 = vpop.eup %1134 }
 0x6dc   :  { %vm616_vm7 = vmor %vm614_vm6, %vm615_vm5  ;;  %v1137_v2 = vpop.eup %1136 }
 0x6dd   :  { %v611_v48 = vsub.f32 1.0, %v610_v47  ;;  %v608_v3 = vadd.f32 1.0, %v1137_v2 }
 0x6df   :  { %v612_v50 = vmul.f32 %v1133_v45, %v611_v48  ;;  %1138 = vrcp.f32 %v608_v3  ;;  %v635_v16 = vand.u32 2147483648, %v608_v3  ;;  %vm629_vm11 = vweird.f32 %v608_v3 }
 0x6e0   :  { %v633_v17 = vand.u32 2147483647, %v608_v3 }
 0x6e1   :  { %v613_v52 = vadd.f32 %v1133_v45, %v612_v50  ;;  %v636_v19 = vor.u32 1.1754944e-38, %v635_v16 }
 0x6e2   :  { %vm634_vm13 = vcmp.eq.f32.partialorder %v633_v17, 8.507059e+37 }
 0x6e3   :  { %v617_v55 = vsel %vm616_vm7, %v1133_v45, %v613_v52 }
 0x6e4   :  { %v622_v57 = vsel %vm619_vm8, %v621_v53, %v617_v55 }
 0x6e5   :  { %v644_v58 = vmul.f32 %v1135_v56, %v622_v57  ;;  %v643_v0 = vmul.f32 %v641_v54, %v622_v57  ;;  %v1139_v4 = vpop.eup %1138 }
 0x6e6   :  { %v625_v5 = vmul.f32 %v1139_v4, %v608_v3  ;;  %vm630_vm10 = vweird.f32 %v1139_v4 }
 0x6e7   :  { %646 = vrot.lane.b32.xlu2 %v644_v58, %s1290_s0  ;;  %vm631_vm12 = vmor %vm629_vm11, %vm630_vm10 }
 0x6e8   :  { %v626_v6 = vsub.f32 1.0, %v625_v5 }
 0x6ea   :  { %v627_v8 = vmul.f32 %v1139_v4, %v626_v6 }
 0x6ec   :  { %v628_v14 = vadd.f32 %v1139_v4, %v627_v8 }
 0x6ee   :  { %v632_v18 = vsel %vm631_vm12, %v1139_v4, %v628_v14 }
 0x6ef   :  { %v637_v22 = vsel %vm634_vm13, %v636_v19, %v632_v18 }
 0x741   :  { %v647_v11 = vpop.permute.xlu2 %646 }
 0x742   :  { %v649_v13 = vadd.f32 %v647_v11, %v643_v0 }
 0x744   :  { %1140 = vtanh.f32 %v649_v13  ;;  %v745_v33 = vrot.slane %v649_v13, 6 }
 0x74a   :  { %v1141_v20 = vpop.eup %1140 }
 0x74b   :  { %v651_v59 = vmul.f32 %v1141_v20, %v637_v22 }
 0x74d   :  { %653 = vrot.lane.b32.xlu0 %v651_v59, %s1290_s0 }
 0x7bf   :  { %v654_v60 = vpop.permute.xlu0 %653 }
 0x7c0   :  { %1058 = vmatmul.msk.f32.vlgmr.msrb.gmra.mxu0 %vm145_vm9, %v654_v60  ;;  %1059 = vmatmul.msk.f32.vlgmr.msrb.gmra.mxu1 %vm145_vm9, %v654_v60 }
 0x83d   :  { %v674_v61 = vpop.f32.mrf.mxu0  ;;  %v694_v15 = vpop.f32.mrf.mxu1 }
 0x83e   :  { %v699_v62 = vrot.slane %v674_v61, 6  ;;  %v700_v21 = vrot.slane %v694_v15, 6 }
 0x840   :  { %v703_v7 = vadd.f32 %v699_v62, %v1468_v63  ;;  %v704_v24 = vadd.f32 %v700_v21, %v1471_v12 }
 0x842   :  { %v1060_v9 = vmul.f32 -1.442695, %v703_v7  ;;  %v1061_v39 = vmul.f32 -1.442695, %v704_v24 }
 0x844   :  { %1142 = vpow2.f32 %v1060_v9 }
 0x84a   :  { %v1143_v28 = vpop.eup %1142 }
 0x84b   :  { %v711_v10 = vadd.f32 1.0, %v1143_v28 }
 0x84d   :  { %1144 = vrcp.f32 %v711_v10  ;;  %v724_v27 = vand.u32 2147483648, %v711_v10  ;;  %v722_v30 = vand.u32 2147483647, %v711_v10  ;;  %vm718_vm15 = vweird.f32 %v711_v10 }
 0x84e   :  { %1146 = vtanh.f32 %v704_v24 }
 0x84f   :  { %v725_v32 = vor.u32 1.1754944e-38, %v724_v27  ;;  %vm723_vm2 = vcmp.eq.f32.partialorder %v722_v30, 8.507059e+37  ;;  %1148 = vpow2.f32 %v1061_v39 }
 0x853   :  { %v1145_v23 = vpop.eup %1144 }
 0x854   :  { %v714_v25 = vmul.f32 %v1145_v23, %v711_v10  ;;  %vm719_vm14 = vweird.f32 %v1145_v23  ;;  %v1147_v35 = vpop.eup %1146 }
 0x855   :  { %vm720_vm1 = vmor %vm718_vm15, %vm719_vm14  ;;  %v1149_v40 = vpop.eup %1148 }
 0x856   :  { %v715_v26 = vsub.f32 1.0, %v714_v25  ;;  %v712_v41 = vadd.f32 1.0, %v1149_v40 }
 0x858   :  { %v716_v29 = vmul.f32 %v1145_v23, %v715_v26  ;;  %1150 = vrcp.f32 %v712_v41  ;;  %v739_v49 = vand.u32 2147483648, %v712_v41  ;;  %vm733_vm4 = vweird.f32 %v712_v41 }
 0x859   :  { %v737_v50 = vand.u32 2147483647, %v712_v41 }
 0x85a   :  { %v717_v31 = vadd.f32 %v1145_v23, %v716_v29  ;;  %v740_v52 = vor.u32 1.1754944e-38, %v739_v49 }
 0x85b   :  { %vm738_vm6 = vcmp.eq.f32.partialorder %v737_v50, 8.507059e+37 }
 0x85c   :  { %v721_v34 = vsel %vm720_vm1, %v1145_v23, %v717_v31 }
 0x85d   :  { %v726_v36 = vsel %vm723_vm2, %v725_v32, %v721_v34 }
 0x85e   :  { %v748_v37 = vmul.f32 %v1147_v35, %v726_v36  ;;  %v747_v38 = vmul.f32 %v745_v33, %v726_v36  ;;  %v1151_v42 = vpop.eup %1150 }
 0x85f   :  { %v729_v43 = vmul.f32 %v1151_v42, %v712_v41  ;;  %vm734_vm3 = vweird.f32 %v1151_v42 }
 0x860   :  { %750 = vrot.lane.b32.xlu1 %v748_v37, %s1290_s0  ;;  %vm735_vm5 = vmor %vm733_vm4, %vm734_vm3 }
 0x861   :  { %v730_v44 = vsub.f32 1.0, %v729_v43 }
 0x863   :  { %v731_v45 = vmul.f32 %v1151_v42, %v730_v44 }
 0x865   :  { %v732_v48 = vadd.f32 %v1151_v42, %v731_v45 }
 0x867   :  { %v736_v51 = vsel %vm735_vm5, %v1151_v42, %v732_v48 }
 0x868   :  { %v741_v54 = vsel %vm738_vm6, %v740_v52, %v736_v51 }
 0x8d2   :  { %v751_v46 = vpop.permute.xlu1 %750 }
 0x8d3   :  { %v753_v47 = vadd.f32 %v751_v46, %v747_v38 }
 0x8d5   :  { %1152 = vtanh.f32 %v753_v47  ;;  %v850_v22 = vrot.slane %v753_v47, 6 }
 0x8db   :  { %v1153_v53 = vpop.eup %1152 }
 0x8dc   :  { %v755_v55 = vmul.f32 %v1153_v53, %v741_v54 }
 0x8de   :  { %v757_v56 = vrot.slane %v755_v55, 2 }
 0x8e0   :  { %758 = vrot.lane.b32.xlu2 %v757_v56, %s1290_s0 }
 0x93a   :  { %v759_v57 = vpop.permute.xlu2 %758 }
 0x93b   :  { %1062 = vmatmul.msk.f32.vlgmr.msrb.gmra.mxu2 %vm145_vm9, %v759_v57  ;;  %1063 = vmatmul.msk.f32.vlgmr.msrb.gmra.mxu3 %vm145_vm9, %v759_v57 }
 0x9be   :  { %v779_v58 = vpop.f32.mrf.mxu2  ;;  %v799_v5 = vpop.f32.mrf.mxu3 }
 0x9bf   :  { %v804_v0 = vrot.slane %v779_v58, 4  ;;  %v805_v6 = vrot.slane %v799_v5, 4  ;;  %v85_v5 = vld [vmem:[#allocation5 + $0xf0] sm:$0xff] }
 0x9c1   :  { %v808_v1 = vadd.f32 %v804_v0, %v1468_v63  ;;  %v809_v11 = vadd.f32 %v805_v6, %v1471_v12  ;;  %v84_v6 = vld [vmem:[#allocation5 + $0xe0] sm:$0xff] }
 0x9c3   :  { %v1064_v2 = vmul.f32 -1.442695, %v808_v1  ;;  %v1065_v9 = vmul.f32 -1.442695, %v809_v11 }
 0x9c5   :  { %1154 = vpow2.f32 %v1064_v2 }
 0x9cb   :  { %v1155_v3 = vpop.eup %1154 }
 0x9cc   :  { %v816_v4 = vadd.f32 1.0, %v1155_v3  ;;  %v87_v3 = vld [vmem:[#allocation5 + $0x110] sm:$0xff] }
 0x9cd   :  { %983 = vmatpush.msra.mxu2 %v87_v3 }
 0x9ce   :  { %1156 = vrcp.f32 %v816_v4  ;;  %v829_v16 = vand.u32 2147483648, %v816_v4  ;;  %v827_v18 = vand.u32 2147483647, %v816_v4  ;;  %vm823_vm8 = vweird.f32 %v816_v4 }
 0x9cf   :  { %1158 = vtanh.f32 %v809_v11  ;;  %v83_v11 = vld [vmem:[#allocation5 + $0xd0] sm:$0xff] }
 0x9d0   :  { %v830_v20 = vor.u32 1.1754944e-38, %v829_v16  ;;  %vm828_vm11 = vcmp.eq.f32.partialorder %v827_v18, 8.507059e+37  ;;  %1160 = vpow2.f32 %v1065_v9  ;;  %v81_v16 = vld [vmem:[#allocation5 + $0xb0] sm:$0xff]  ;;  %v80_v18 = vld [vmem:[#allocation5 + $0xa0] sm:$0xff] }
 0x9d4   :  { %v1157_v8 = vpop.eup %1156 }
 0x9d5   :  { %v819_v13 = vmul.f32 %v1157_v8, %v816_v4  ;;  %vm824_vm7 = vweird.f32 %v1157_v8  ;;  %v1159_v60 = vpop.eup %1158  ;;  %v86_v4 = vld [vmem:[#allocation5 + $0x100] sm:$0xff] }
 0x9d6   :  { %vm825_vm10 = vmor %vm823_vm8, %vm824_vm7  ;;  %v1161_v28 = vpop.eup %1160  ;;  %984 = vmatpush.msra.mxu2 %v86_v4 }
 0x9d7   :  { %v820_v14 = vsub.f32 1.0, %v819_v13  ;;  %v817_v10 = vadd.f32 1.0, %v1161_v28 }
 0x9d8   :  { %985 = vmatpush.msra.mxu2 %v85_v5 }
 0x9d9   :  { %v821_v17 = vmul.f32 %v1157_v8, %v820_v14  ;;  %1162 = vrcp.f32 %v817_v10  ;;  %v844_v29 = vand.u32 2147483648, %v817_v10  ;;  %vm838_vm13 = vweird.f32 %v817_v10  ;;  %v82_v14 = vld [vmem:[#allocation5 + $0xc0] sm:$0xff] }
 0x9da   :  { %v842_v30 = vand.u32 2147483647, %v817_v10  ;;  %986 = vmatpush.msra.mxu2 %v84_v6 }
 0x9db   :  { %v822_v19 = vadd.f32 %v1157_v8, %v821_v17  ;;  %v845_v32 = vor.u32 1.1754944e-38, %v844_v29 }
 0x9dc   :  { %vm843_vm15 = vcmp.eq.f32.partialorder %v842_v30, 8.507059e+37  ;;  %987 = vmatpush.msra.mxu2 %v83_v11 }
 0x9dd   :  { %v826_v59 = vsel %vm825_vm10, %v1157_v8, %v822_v19  ;;  %vm1016_vm10 = vcmask 386048  }
 0x9de   :  { %v831_v61 = vsel %vm828_vm11, %v830_v20, %v826_v59  ;;  %988 = vmatpush.msra.mxu2 %v82_v14 }
 0x9df   :  { %v853_v62 = vmul.f32 %v1159_v60, %v831_v61  ;;  %v852_v7 = vmul.f32 %v850_v22, %v831_v61  ;;  %v1163_v15 = vpop.eup %1162 }
 0x9e0   :  { %v834_v21 = vmul.f32 %v1163_v15, %v817_v10  ;;  %vm839_vm12 = vweird.f32 %v1163_v15  ;;  %989 = vmatpush.msra.mxu2 %v81_v16 }
 0x9e1   :  { %855 = vrot.lane.b32.xlu0 %v853_v62, %s1290_s0  ;;  %vm840_vm14 = vmor %vm838_vm13, %vm839_vm12 }
 0x9e2   :  { %v835_v23 = vsub.f32 1.0, %v834_v21  ;;  %990 = vmatpush.msra.mxu2 %v80_v18  ;;  %v998_v21 = vld [vmem:[#allocation7] sm:$0x3] }
 0x9e4   :  { %v836_v24 = vmul.f32 %v1163_v15, %v835_v23 }
 0x9e6   :  { %v837_v27 = vadd.f32 %v1163_v15, %v836_v24  ;;  %v89_v24 = vld [vmem:[#allocation5 + $0x120] ss:$8 sm:$0x3] }
 0x9e8   :  { %v841_v31 = vsel %vm840_vm14, %v1163_v15, %v837_v27 }
 0x9e9   :  { %v846_v34 = vsel %vm843_vm15, %v845_v32, %v841_v31 }
 0xa53   :  { %v856_v25 = vpop.permute.xlu0 %855 }
 0xa54   :  { %v858_v26 = vadd.f32 %v856_v25, %v852_v7  ;;  %v967_v25 = vperm.slane %v89_v24, 0 }
 0xa56   :  { %1164 = vtanh.f32 %v858_v26  ;;  %v955_v54 = vrot.slane %v858_v26, 6 }
 0xa5c   :  { %v1165_v33 = vpop.eup %1164 }
 0xa5d   :  { %v860_v35 = vmul.f32 %v1165_v33, %v846_v34 }
 0xa5f   :  { %v862_v36 = vrot.slane %v860_v35, 4 }
 0xa61   :  { %863 = vrot.lane.b32.xlu1 %v862_v36, %s1290_s0 }
 0xa69   :  { %1000 = vrot.lane.b32.xlu1 %v998_v21, %s1284_s21 }
 0xad3   :  { %v864_v37 = vpop.permute.xlu1 %863 }
 0xad4   :  { %1066 = vmatmul.msk.f32.vlgmr.msra.gmra.mxu0 %vm145_vm9, %v864_v37  ;;  %1067 = vmatmul.msk.f32.vlgmr.msra.gmra.mxu1 %vm145_vm9, %v864_v37 }
 0xadb   :  { %v1001_v31 = vpop.permute.xlu1 %1000 }
 0xb51   :  { %v884_v38 = vpop.f32.mrf.mxu0  ;;  %v904_v44 = vpop.f32.mrf.mxu1 }
 0xb52   :  { %v909_v39 = vrot.slane %v884_v38, 2  ;;  %v910_v45 = vrot.slane %v904_v44, 2 }
 0xb54   :  { %v913_v40 = vadd.f32 %v909_v39, %v1468_v63  ;;  %v914_v47 = vadd.f32 %v910_v45, %v1471_v12 }
 0xb56   :  { %v1068_v41 = vmul.f32 -1.442695, %v913_v40  ;;  %v1069_v12 = vmul.f32 -1.442695, %v914_v47 }
 0xb58   :  { %1166 = vpow2.f32 %v1068_v41 }
 0xb5e   :  { %v1167_v42 = vpop.eup %1166 }
 0xb5f   :  { %v921_v43 = vadd.f32 1.0, %v1167_v42 }
 0xb61   :  { %1168 = vrcp.f32 %v921_v43  ;;  %v934_v50 = vand.u32 2147483648, %v921_v43  ;;  %v932_v52 = vand.u32 2147483647, %v921_v43  ;;  %vm928_vm2 = vweird.f32 %v921_v43 }
 0xb62   :  { %1170 = vtanh.f32 %v914_v47 }
 0xb63   :  { %v935_v63 = vor.u32 1.1754944e-38, %v934_v50  ;;  %vm933_vm4 = vcmp.eq.f32.partialorder %v932_v52, 8.507059e+37  ;;  %1172 = vpow2.f32 %v1069_v12 }
 0xb67   :  { %v1169_v46 = vpop.eup %1168 }
 0xb68   :  { %v924_v48 = vmul.f32 %v1169_v46, %v921_v43  ;;  %vm929_vm1 = vweird.f32 %v1169_v46  ;;  %v1171_v56 = vpop.eup %1170 }
 0xb69   :  { %vm930_vm3 = vmor %vm928_vm2, %vm929_vm1  ;;  %v1173_v1 = vpop.eup %1172 }
 0xb6a   :  { %v925_v49 = vsub.f32 1.0, %v924_v48  ;;  %v922_v2 = vadd.f32 1.0, %v1173_v1 }
 0xb6c   :  { %v926_v51 = vmul.f32 %v1169_v46, %v925_v49  ;;  %1174 = vrcp.f32 %v922_v2  ;;  %v949_v60 = vand.u32 2147483648, %v922_v2  ;;  %vm943_vm6 = vweird.f32 %v922_v2 }
 0xb6d   :  { %v947_v61 = vand.u32 2147483647, %v922_v2 }
 0xb6e   :  { %v927_v53 = vadd.f32 %v1169_v46, %v926_v51  ;;  %v950_v7 = vor.u32 1.1754944e-38, %v949_v60 }
 0xb6f   :  { %vm948_vm8 = vcmp.eq.f32.partialorder %v947_v61, 8.507059e+37 }
 0xb70   :  { %v931_v55 = vsel %vm930_vm3, %v1169_v46, %v927_v53 }
 0xb71   :  { %v936_v57 = vsel %vm933_vm4, %v935_v63, %v931_v55 }
 0xb72   :  { %v958_v58 = vmul.f32 %v1171_v56, %v936_v57  ;;  %v957_v0 = vmul.f32 %v955_v54, %v936_v57  ;;  %v1175_v8 = vpop.eup %1174 }
 0xb73   :  { %v939_v13 = vmul.f32 %v1175_v8, %v922_v2  ;;  %vm944_vm5 = vweird.f32 %v1175_v8 }
 0xb74   :  { %960 = vrot.lane.b32.xlu2 %v958_v58, %s1290_s0  ;;  %vm945_vm7 = vmor %vm943_vm6, %vm944_vm5 }
 0xb75   :  { %v940_v17 = vsub.f32 1.0, %v939_v13 }
 0xb77   :  { %v941_v19 = vmul.f32 %v1175_v8, %v940_v17 }
 0xb79   :  { %v942_v59 = vadd.f32 %v1175_v8, %v941_v19 }
 0xb7b   :  { %v946_v62 = vsel %vm945_vm7, %v1175_v8, %v942_v59 }
 0xb7c   :  { %v951_v28 = vsel %vm948_vm8, %v950_v7, %v946_v62 }
 0xbce   :  { %v961_v20 = vpop.permute.xlu2 %960 }
 0xbcf   :  { %v963_v22 = vadd.f32 %v961_v20, %v957_v0 }
 0xbd1   :  { %1176 = vtanh.f32 %v963_v22 }
 0xbd7   :  { %v1177_v9 = vpop.eup %1176 }
 0xbd8   :  { %v965_v10 = vmul.f32 %v1177_v9, %v951_v28 }
 0xbda   :  { %v970_v15 = vrot.slane %v965_v10, 6 }
 0xbdc   :  { %971 = vrot.lane.b32.xlu0 %v970_v15, %s1290_s0 }
 0xc4e   :  { %v972_v23 = vpop.permute.xlu0 %971 }
 0xc4f   :  { %1070 = vmatmul.msk.f32.vlgmr.msra.gmra.mxu2 %vm145_vm9, %v972_v23  ;;  %vm1014_vm9 = vcmask 261120  }
 0xcd2   :  { %v992_v26 = vpop.f32.mrf.mxu2 }
 0xcd3   :  { %v993_v27 = vadd.f32 %v992_v26, %v967_v25 }
 0xcd5   :  { %v995_v29 = vmul.f32 0.5, %v993_v27  ;;  %1010 = vrot.lane.b32.xlu0 %v993_v27, %s1284_s21 }
 0xcd7   :  { %v996_v30 = vmul.f32 1.442695, %v995_v29 }
 0xcd9   :  { %1178 = vpow2.f32 %v996_v30 }
 0xcdf   :  { %v1179_v32 = vpop.eup %1178 }
 0xce0   :  { %v1003_v33 = vmul.f32 %v1179_v32, %v1001_v31 }
 0xce2   :  { %1005 = vrot.lane.b32.xlu2 %v1003_v33, %s1291_s2 }
 0xd3c   :  { %v1006_v34 = vpop.permute.xlu2 %1005 }
 0xd3d   :  { %v1008_v35 = vadd.f32 %v1006_v34, %v993_v27 }
 0xd47   :  { %v1011_v36 = vpop.permute.xlu0 %1010 }
 0xd48   :  { %v1013_v37 = vsel %vm92_vm0, %v1008_v35, %v1011_v36 }
 0xd49   :  { %v1015_v38 = vsel %vm1014_vm9, %v1013_v37, %v1011_v36 }
 0xd4a   :  { %1017 = vst.msk [vmem:[#allocation8] sm:$0x3] %vm1016_vm10, %v1015_v38 }
 0xd4b   :  { %1028 = dma.vmem_to_hbm [thread:$0]  %s1024_s4, 32, %s1026_s7, [#allocation4]  }
 0xd4c   :  { %1280 = dma.done.wait [#allocation4], 32  }
 0xd4d   :  { %1281 = vsyncadd [#allocation4], 4294967264 }
 0xd4e   :  { %1033 = vsyncpa [#allocation3], 1 }
 0xd4f   :  { %1034 = vsyncpa [#allocation6], 1 }
 0xd50   :  { %1035 = vsyncpa [#allocation4], 1 }

</bundles_post_ra>
